<compile_context>
chip_gen: v5e
topology: v5e:2x2
jax: 0.10.0
libtpu: 0.0.40
codegen_flags: <defaults>
</compile_context>

<pallas_src>
import jax
import jax.numpy as jnp
from jax.experimental import pallas as pl
from jax.experimental.pallas import tpu as pltpu

H1, H2, H3 = 128, 64, 32
TM_MAX = 512  # batch rows per grid step (~85% of HBM roofline at 512-row tiles)


def _qnet_kernel(x_ref, w1_ref, b1_ref, w2_ref, b2_ref, w3_ref, b3_ref,
                 w4_ref, b4_ref, o_ref):
    x = x_ref[...].astype(jnp.float32)

    h = jnp.dot(x, w1_ref[...], preferred_element_type=jnp.float32) + b1_ref[...]
    h = jnp.maximum(h, 0.0)

    h = jnp.dot(h, w2_ref[...], preferred_element_type=jnp.float32) + b2_ref[...]
    h = jnp.maximum(h, 0.0)

    h = jnp.dot(h, w3_ref[...], preferred_element_type=jnp.float32) + b3_ref[...]
    h = jnp.maximum(h, 0.0)

    # Final 32 -> 1 layer on VPU (elementwise mul) + XLU lane reduction instead
    # of a 1-wide (127/128 wasted columns) MXU matmul; avoids output padding.
    y = jnp.sum(h * w4_ref[...], axis=-1, keepdims=True) + b4_ref[...]
    o_ref[...] = y.astype(o_ref.dtype)


def _pick_tile(batch, input_dim):
    """Largest row tile (multiple of 8) whose double-buffered x slab fits a
    conservative VMEM budget; shrinks to the (padded) batch if batch is small."""
    budget_bytes = 8 * 1024 * 1024  # for the 2x double-buffered x tile
    tm = TM_MAX
    while tm > 8 and 2 * tm * input_dim * 4 > budget_bytes:
        tm //= 2
    if batch < tm:
        tm = max(8, ((batch + 7) // 8) * 8)
    return tm


@jax.jit
def qnetwork_forward(x, params):
    """x: (batch, input_dim) float32.  Returns (batch, 1) float32."""
    w1, b1, w2, b2, w3, b3, w4, b4 = params
    batch, input_dim = x.shape

    # ---- batch tiling: pick a tile (multiple of 8), pad batch up to it ------
    tm = _pick_tile(batch, input_dim)
    nb = pl.cdiv(batch, tm)
    batch_pad = nb * tm
    if batch_pad != batch:
        x = jnp.pad(x, ((0, batch_pad - batch), (0, 0)))

    # Biases as (1, N) rows; final-layer weight as a (1, 32) row, bias (1, 1).
    b1_2d = b1.reshape(1, H1)
    b2_2d = b2.reshape(1, H2)
    b3_2d = b3.reshape(1, H3)
    w4_row = w4.reshape(1, H3)      # (32, 1) -> (1, 32)
    b4_2d = b4.reshape(1, 1)

    # Weights/biases: constant block index -> DMA'd once, resident across grid.
    const = lambda shape: pl.BlockSpec(shape, lambda i: tuple(0 for _ in shape))

    weight_bytes = 4 * (input_dim * H1 + H1 + H1 * H2 + H2 + H2 * H3 + H3 + H3 + 1)
    cost = pl.CostEstimate(
        flops=2 * batch_pad * (input_dim * H1 + H1 * H2 + H2 * H3 + H3),
        transcendentals=0,
        bytes_accessed=4 * batch_pad * (input_dim + 1) + weight_bytes,
    )

    out = pl.pallas_call(
        _qnet_kernel,
        out_shape=jax.ShapeDtypeStruct((batch_pad, 1), jnp.float32),
        grid=(nb,),
        in_specs=[
            pl.BlockSpec((tm, input_dim), lambda i: (i, 0)),
            const((input_dim, H1)), const((1, H1)),
            const((H1, H2)), const((1, H2)),
            const((H2, H3)), const((1, H3)),
            const((1, H3)), const((1, 1)),
        ],
        out_specs=pl.BlockSpec((tm, 1), lambda i: (i, 0)),
        compiler_params=pltpu.CompilerParams(
            dimension_semantics=("parallel",)),
        cost_estimate=cost,
    )(x, w1, b1_2d, w2, b2_2d, w3, b3_2d, w4_row, b4_2d)

    return out[:batch]


def init_params(key, input_dim):
    """Deterministic init matching QNetwork.__init__ shapes.
    Weights stored as (in_features, out_features)."""
    ks = jax.random.split(key, 8)

    def linear(kw, kb, fan_in, fan_out):
        bound = 1.0 / jnp.sqrt(jnp.float32(fan_in))
        w = jax.random.uniform(kw, (fan_in, fan_out), jnp.float32, -bound, bound)
        b = jax.random.uniform(kb, (fan_out,), jnp.float32, -bound, bound)
        return w, b

    w1, b1 = linear(ks[0], ks[1], input_dim, H1)
    w2, b2 = linear(ks[2], ks[3], H1, H2)
    w3, b3 = linear(ks[4], ks[5], H2, H3)
    w4, b4 = linear(ks[6], ks[7], H3, 1)
    return (w1, b1, w2, b2, w3, b3, w4, b4)


def reference_forward(x, params):
    w1, b1, w2, b2, w3, b3, w4, b4 = params
    h = jnp.maximum(x @ w1 + b1, 0.0)
    h = jnp.maximum(h @ w2 + b2, 0.0)
    h = jnp.maximum(h @ w3 + b3, 0.0)
    # exact f32 final dot to mirror the kernel's exact VPU reduction
    return jnp.dot(h, w4, precision=jax.lax.Precision.HIGHEST) + b4


if __name__ == "__main__":
    key = jax.random.PRNGKey(0)
    k_x, k_p = jax.random.split(key)

    batch, input_dim = 37, 32   # non-multiple-of-8 batch exercises the padding path
    x = jax.random.normal(k_x, (batch, input_dim), jnp.float32)
    params = init_params(k_p, input_dim)

    out = jax.block_until_ready(qnetwork_forward(x, params))

    ref = reference_forward(x, params)
    assert out.shape == (batch, 1), out.shape
    assert jnp.allclose(out, ref, atol=1e-4, rtol=1e-4), (
        f"max abs err {jnp.max(jnp.abs(out - ref))}")

    print("KERNEL_OK")
</pallas_src>

<mosaic_0001>
module attributes {stable_mosaic.version = 11 : i64} {
  func.func @_qnet_kernel(%arg0: i32, %arg1: memref<40x32xf32, #tpu.memory_space<vmem>>, %arg2: memref<32x128xf32, #tpu.memory_space<vmem>>, %arg3: memref<1x128xf32, #tpu.memory_space<vmem>>, %arg4: memref<128x64xf32, #tpu.memory_space<vmem>>, %arg5: memref<1x64xf32, #tpu.memory_space<vmem>>, %arg6: memref<64x32xf32, #tpu.memory_space<vmem>>, %arg7: memref<1x32xf32, #tpu.memory_space<vmem>>, %arg8: memref<1x32xf32, #tpu.memory_space<vmem>>, %arg9: memref<1x1xf32, #tpu.memory_space<vmem>>, %arg10: memref<40x1xf32, #tpu.memory_space<vmem>>) attributes {dimension_semantics = [#tpu.dimension_semantics<parallel>], iteration_bounds = array<i64: 1>, scalar_prefetch = 0 : i64, scratch_operands = 0 : i64, tpu.core_type = #tpu.core_type<tc>, window_params = [{transform_indices = @transform_0, window_bounds = array<i64: 40, 32>}, {pipeline_mode = #tpu.pipeline_mode<synchronous>, transform_indices = @transform_1, window_bounds = array<i64: 32, 128>}, {pipeline_mode = #tpu.pipeline_mode<synchronous>, transform_indices = @transform_2, window_bounds = array<i64: 1, 128>}, {pipeline_mode = #tpu.pipeline_mode<synchronous>, transform_indices = @transform_3, window_bounds = array<i64: 128, 64>}, {pipeline_mode = #tpu.pipeline_mode<synchronous>, transform_indices = @transform_4, window_bounds = array<i64: 1, 64>}, {pipeline_mode = #tpu.pipeline_mode<synchronous>, transform_indices = @transform_5, window_bounds = array<i64: 64, 32>}, {pipeline_mode = #tpu.pipeline_mode<synchronous>, transform_indices = @transform_6, window_bounds = array<i64: 1, 32>}, {pipeline_mode = #tpu.pipeline_mode<synchronous>, transform_indices = @transform_7, window_bounds = array<i64: 1, 32>}, {pipeline_mode = #tpu.pipeline_mode<synchronous>, transform_indices = @transform_8, window_bounds = array<i64: 1, 1>}, {transform_indices = @transform_9, window_bounds = array<i64: 40, 1>}]} {
    %c0 = arith.constant 0 : index
    %c0_0 = arith.constant 0 : index
    %0 = vector.load %arg1[%c0, %c0_0] : memref<40x32xf32, #tpu.memory_space<vmem>>, vector<40x32xf32>
    %c0_1 = arith.constant 0 : index
    %c0_2 = arith.constant 0 : index
    %1 = vector.load %arg2[%c0_1, %c0_2] : memref<32x128xf32, #tpu.memory_space<vmem>>, vector<32x128xf32>
    %cst = arith.constant dense<0.000000e+00> : vector<40x128xf32>
    %2 = tpu.matmul %0, %1, %cst {dimension_numbers = #tpu.dot_dimension_numbers<[1], [0], [0], [1], [0, 0, 1, 1], [], []>} : vector<40x32xf32>, vector<32x128xf32>, vector<40x128xf32> -> vector<40x128xf32>
    %c0_3 = arith.constant 0 : index
    %c0_4 = arith.constant 0 : index
    %3 = vector.load %arg3[%c0_3, %c0_4] : memref<1x128xf32, #tpu.memory_space<vmem>>, vector<1x128xf32>
    %4 = vector.broadcast %3 : vector<1x128xf32> to vector<40x128xf32>
    %5 = arith.addf %2, %4 : vector<40x128xf32>
    %cst_5 = arith.constant 0.000000e+00 : f32
    %6 = vector.broadcast %cst_5 : f32 to vector<40x128xf32>
    %7 = arith.maximumf %5, %6 : vector<40x128xf32>
    %c0_6 = arith.constant 0 : index
    %c0_7 = arith.constant 0 : index
    %8 = vector.load %arg4[%c0_6, %c0_7] : memref<128x64xf32, #tpu.memory_space<vmem>>, vector<128x64xf32>
    %cst_8 = arith.constant dense<0.000000e+00> : vector<40x64xf32>
    %9 = tpu.matmul %7, %8, %cst_8 {dimension_numbers = #tpu.dot_dimension_numbers<[1], [0], [0], [1], [0, 0, 1, 1], [], []>} : vector<40x128xf32>, vector<128x64xf32>, vector<40x64xf32> -> vector<40x64xf32>
    %c0_9 = arith.constant 0 : index
    %c0_10 = arith.constant 0 : index
    %10 = vector.load %arg5[%c0_9, %c0_10] : memref<1x64xf32, #tpu.memory_space<vmem>>, vector<1x64xf32>
    %11 = vector.broadcast %10 : vector<1x64xf32> to vector<40x64xf32>
    %12 = arith.addf %9, %11 : vector<40x64xf32>
    %cst_11 = arith.constant 0.000000e+00 : f32
    %13 = vector.broadcast %cst_11 : f32 to vector<40x64xf32>
    %14 = arith.maximumf %12, %13 : vector<40x64xf32>
    %c0_12 = arith.constant 0 : index
    %c0_13 = arith.constant 0 : index
    %15 = vector.load %arg6[%c0_12, %c0_13] : memref<64x32xf32, #tpu.memory_space<vmem>>, vector<64x32xf32>
    %cst_14 = arith.constant dense<0.000000e+00> : vector<40x32xf32>
    %16 = tpu.matmul %14, %15, %cst_14 {dimension_numbers = #tpu.dot_dimension_numbers<[1], [0], [0], [1], [0, 0, 1, 1], [], []>} : vector<40x64xf32>, vector<64x32xf32>, vector<40x32xf32> -> vector<40x32xf32>
    %c0_15 = arith.constant 0 : index
    %c0_16 = arith.constant 0 : index
    %17 = vector.load %arg7[%c0_15, %c0_16] : memref<1x32xf32, #tpu.memory_space<vmem>>, vector<1x32xf32>
    %18 = vector.broadcast %17 : vector<1x32xf32> to vector<40x32xf32>
    %19 = arith.addf %16, %18 : vector<40x32xf32>
    %cst_17 = arith.constant 0.000000e+00 : f32
    %20 = vector.broadcast %cst_17 : f32 to vector<40x32xf32>
    %21 = arith.maximumf %19, %20 : vector<40x32xf32>
    %c0_18 = arith.constant 0 : index
    %c0_19 = arith.constant 0 : index
    %22 = vector.load %arg8[%c0_18, %c0_19] : memref<1x32xf32, #tpu.memory_space<vmem>>, vector<1x32xf32>
    %23 = vector.broadcast %22 : vector<1x32xf32> to vector<40x32xf32>
    %24 = arith.mulf %21, %23 : vector<40x32xf32>
    %cst_20 = arith.constant dense<0.000000e+00> : vector<40xf32>
    %25 = vector.multi_reduction <add>, %24, %cst_20 [1] : vector<40x32xf32> to vector<40xf32>
    %26 = vector.shape_cast %25 : vector<40xf32> to vector<40x1xf32>
    %c0_21 = arith.constant 0 : index
    %c0_22 = arith.constant 0 : index
    %27 = vector.load %arg9[%c0_21, %c0_22] : memref<1x1xf32, #tpu.memory_space<vmem>>, vector<1x1xf32>
    %28 = vector.broadcast %27 : vector<1x1xf32> to vector<40x1xf32>
    %29 = arith.addf %26, %28 : vector<40x1xf32>
    %c0_23 = arith.constant 0 : index
    %c0_24 = arith.constant 0 : index
    %30 = vector.load %arg10[%c0_23, %c0_24] : memref<40x1xf32, #tpu.memory_space<vmem>>, vector<40x1xf32>
    tpu.vector_store %arg10[%c0_23, %c0_24], %29 {strides = array<i32>} : memref<40x1xf32, #tpu.memory_space<vmem>>, vector<40x1xf32>,
    return
  }
  func.func @transform_0(%arg0: i32) -> (i32, i32) {
    %c0_i32 = arith.constant 0 : i32
    %c0_i32_0 = arith.constant 0 : i32
    return %arg0, %c0_i32 : i32, i32
  }
  func.func @transform_1(%arg0: i32) -> (i32, i32) {
    %c0_i32 = arith.constant 0 : i32
    %c0_i32_0 = arith.constant 0 : i32
    %c0_i32_1 = arith.constant 0 : i32
    return %c0_i32, %c0_i32_0 : i32, i32
  }
  func.func @transform_2(%arg0: i32) -> (i32, i32) {
    %c0_i32 = arith.constant 0 : i32
    %c0_i32_0 = arith.constant 0 : i32
    %c0_i32_1 = arith.constant 0 : i32
    return %c0_i32, %c0_i32_0 : i32, i32
  }
  func.func @transform_3(%arg0: i32) -> (i32, i32) {
    %c0_i32 = arith.constant 0 : i32
    %c0_i32_0 = arith.constant 0 : i32
    %c0_i32_1 = arith.constant 0 : i32
    return %c0_i32, %c0_i32_0 : i32, i32
  }
  func.func @transform_4(%arg0: i32) -> (i32, i32) {
    %c0_i32 = arith.constant 0 : i32
    %c0_i32_0 = arith.constant 0 : i32
    %c0_i32_1 = arith.constant 0 : i32
    return %c0_i32, %c0_i32_0 : i32, i32
  }
  func.func @transform_5(%arg0: i32) -> (i32, i32) {
    %c0_i32 = arith.constant 0 : i32
    %c0_i32_0 = arith.constant 0 : i32
    %c0_i32_1 = arith.constant 0 : i32
    return %c0_i32, %c0_i32_0 : i32, i32
  }
  func.func @transform_6(%arg0: i32) -> (i32, i32) {
    %c0_i32 = arith.constant 0 : i32
    %c0_i32_0 = arith.constant 0 : i32
    %c0_i32_1 = arith.constant 0 : i32
    return %c0_i32, %c0_i32_0 : i32, i32
  }
  func.func @transform_7(%arg0: i32) -> (i32, i32) {
    %c0_i32 = arith.constant 0 : i32
    %c0_i32_0 = arith.constant 0 : i32
    %c0_i32_1 = arith.constant 0 : i32
    return %c0_i32, %c0_i32_0 : i32, i32
  }
  func.func @transform_8(%arg0: i32) -> (i32, i32) {
    %c0_i32 = arith.constant 0 : i32
    %c0_i32_0 = arith.constant 0 : i32
    %c0_i32_1 = arith.constant 0 : i32
    return %c0_i32, %c0_i32_0 : i32, i32
  }
  func.func @transform_9(%arg0: i32) -> (i32, i32) {
    %c0_i32 = arith.constant 0 : i32
    %c0_i32_0 = arith.constant 0 : i32
    return %arg0, %c0_i32 : i32, i32
  }
}

</mosaic_0001>

<bundles_post_ra>
// kernel: qnetwork_forward.1
= control target key start
LH: loop header
LB: loop body
LE: loop exit
PB: predicated region body
PF: predicated region fallthrough
CT: control target
= control target key end

     0   :  { %vm47_vm0 = vcmask 261120   ;;  %vm169_vm1 = vcmask 523264   ;;  %vm255_vm2 = vcmask 7168   ;;  %s490_s1 = inlined_call_operand.vmem [shape: f32[32,128], index: 1, kind: input, shape index: {}]   ;;  %s491_s0 = inlined_call_operand.vmem [shape: f32[40,32], index: 0, kind: input, shape index: {}]   ;;  %s492_s2 = inlined_call_operand.vmem [shape: f32[1,128], index: 2, kind: input, shape index: {}]   ;;  %s493_s3 = inlined_call_operand.vmem [shape: f32[128,64], index: 3, kind: input, shape index: {}]   ;;  %s494_s4 = inlined_call_operand.vmem [shape: f32[1,64], index: 4, kind: input, shape index: {}]   ;;  %s495_s5 = inlined_call_operand.vmem [shape: f32[64,32], index: 5, kind: input, shape index: {}]   ;;  %s496_s6 = inlined_call_operand.vmem [shape: f32[1,32], index: 6, kind: input, shape index: {}]   ;;  %s497_s7 = inlined_call_operand.vmem [shape: f32[1,32], index: 7, kind: input, shape index: {}]   ;;  %s498_s8 = inlined_call_operand.<no memory space> [shape: f32[1,1], index: 8, kind: input, shape index: {}]   ;;  %s499_s9 = inlined_call_operand.vmem [shape: f32[40,1], index: 9, kind: output, shape index: {}]  }
   0x1   :  { %v42_v0 = vld [vmem:[%s490_s1 + $0x18] sm:$0xff]  ;;  %v41_v1 = vld [vmem:[%s490_s1 + $0x10] sm:$0xff]  ;;  %v40_v2 = vld [vmem:[%s490_s1 + $0x8] sm:$0xff] }
   0x2   :  { %75 = vmatpush.msra.mxu0 %v42_v0  ;;  %v39_v3 = vld [vmem:[%s490_s1] sm:$0xff]  ;;  %v115_v5 = vld [vmem:[%s493_s3 + $0x78] sm:$0xff]  ;;  %v114_v6 = vld [vmem:[%s493_s3 + $0x70] sm:$0xff] }
   0x3   :  { %v34_v4 = vld [vmem:[%s491_s0] sm:$0xff]  ;;  %120 = vmatpush.msra.mxu1 %v115_v5  ;;  %275 = vmatpush.msra.mxu3 %v115_v5  ;;  %v113_v7 = vld [vmem:[%s493_s3 + $0x68] sm:$0xff]  ;;  %v111_v10 = vld [vmem:[%s493_s3 + $0x58] sm:$0xff] }
   0x4   :  { %76 = vmatpush.msra.mxu0 %v41_v1  ;;  %v112_v8 = vld [vmem:[%s493_s3 + $0x60] sm:$0xff]  ;;  %v35_v9 = vld [vmem:[%s491_s0 + $0x8] sm:$0xff]  ;;  %v110_v11 = vld [vmem:[%s493_s3 + $0x50] sm:$0xff] }
   0x5   :  { %121 = vmatpush.msra.mxu1 %v114_v6  ;;  %276 = vmatpush.msra.mxu3 %v114_v6  ;;  %v109_v12 = vld [vmem:[%s493_s3 + $0x48] sm:$0xff]  ;;  %v108_v13 = vld [vmem:[%s493_s3 + $0x40] sm:$0xff]  ;;  %v36_v14 = vld [vmem:[%s491_s0 + $0x10] sm:$0xff] }
   0x6   :  { %77 = vmatpush.msra.mxu0 %v40_v2  ;;  %v107_v15 = vld [vmem:[%s493_s3 + $0x38] sm:$0xff]  ;;  %v106_v16 = vld [vmem:[%s493_s3 + $0x30] sm:$0xff]  ;;  %v105_v17 = vld [vmem:[%s493_s3 + $0x28] sm:$0xff] }
   0x7   :  { %122 = vmatpush.msra.mxu1 %v113_v7  ;;  %277 = vmatpush.msra.mxu3 %v113_v7  ;;  %v104_v18 = vld [vmem:[%s493_s3 + $0x20] sm:$0xff]  ;;  %v37_v19 = vld [vmem:[%s491_s0 + $0x18] sm:$0xff]  ;;  %v102_v22 = vld [vmem:[%s493_s3 + $0x10] sm:$0xff] }
   0x8   :  { %78 = vmatpush.msra.mxu0 %v39_v3  ;;  %v103_v20 = vld [vmem:[%s493_s3 + $0x18] sm:$0xff]  ;;  %v38_v21 = vld [vmem:[%s491_s0 + $0x20] sm:$0xff]  ;;  %v101_v23 = vld [vmem:[%s493_s3 + $0x8] sm:$0xff] }
   0x9   :  { %265 = vmatmul.msk.f32.vlgmr.msra.gmra.mxu0 %vm47_vm0, %v34_v4  ;;  %123 = vmatpush.msra.mxu1 %v112_v8  ;;  %v100_v24 = vld [vmem:[%s493_s3] sm:$0xff]  ;;  %v164_v29 = vld [vmem:[%s495_s5 + $0x38] sm:$0xff]  ;;  %v163_v30 = vld [vmem:[%s495_s5 + $0x30] sm:$0xff] }
   0xa   :  { %278 = vmatpush.msra.mxu3 %v112_v8  ;;  %v291_v25 = vld [vmem:[%s492_s2] ss:$0 sm:$0xff]  ;;  %193 = vmatpush.msra.mxu2 %v164_v29  ;;  %v162_v31 = vld [vmem:[%s495_s5 + $0x28] sm:$0xff]  ;;  %v160_v36 = vld [vmem:[%s495_s5 + $0x18] sm:$0xff] }
   0xb   :  { %124 = vmatpush.msra.mxu1 %v111_v10  ;;  %v161_v34 = vld [vmem:[%s495_s5 + $0x20] sm:$0xff]  ;;  %v159_v46 = vld [vmem:[%s495_s5 + $0x10] sm:$0xff]  ;;  %v158_v47 = vld [vmem:[%s495_s5 + $0x8] sm:$0xff] }
   0xc   :  { %279 = vmatpush.msra.mxu3 %v111_v10  ;;  %194 = vmatpush.msra.mxu2 %v163_v30  ;;  %v157_v48 = vld [vmem:[%s495_s5] sm:$0xff] }
   0xd   :  { %125 = vmatpush.msra.mxu1 %v110_v11  ;;  %v292_v49 = vld [vmem:[%s494_s4] ss:$0 sm:$0xff] }
   0xe   :  { %280 = vmatpush.msra.mxu3 %v110_v11  ;;  %195 = vmatpush.msra.mxu2 %v162_v31  ;;  %v293_v1 = vld [vmem:[%s496_s6] ss:$0 sm:$0xff] }
   0xf   :  { %126 = vmatpush.msra.mxu1 %v109_v12  ;;  %v294_v4 = vld [vmem:[%s497_s7] ss:$0 sm:$0xff] }
  0x10   :  { %281 = vmatpush.msra.mxu3 %v109_v12  ;;  %196 = vmatpush.msra.mxu2 %v161_v34  ;;  %v14_v12 = vstv %s498_s8 }
  0x11   :  { %266 = vmatmul.msk.f32.gmra.mxu0 %vm47_vm0, %v35_v9  ;;  %127 = vmatpush.msra.mxu1 %v108_v13  ;;  %15 = vst [vmem:[#allocation2] sm:$0x1] %v14_v12 }
  0x12   :  { %282 = vmatpush.msra.mxu3 %v108_v13  ;;  %197 = vmatpush.msra.mxu2 %v160_v36 }
  0x13   :  { %128 = vmatpush.msra.mxu1 %v107_v15 }
  0x14   :  { %283 = vmatpush.msra.mxu3 %v107_v15  ;;  %198 = vmatpush.msra.mxu2 %v159_v46 }
  0x15   :  { %129 = vmatpush.msra.mxu1 %v106_v16 }
  0x16   :  { %284 = vmatpush.msra.mxu3 %v106_v16  ;;  %199 = vmatpush.msra.mxu2 %v158_v47 }
  0x17   :  { %130 = vmatpush.msra.mxu1 %v105_v17 }
  0x18   :  { %285 = vmatpush.msra.mxu3 %v105_v17  ;;  %200 = vmatpush.msra.mxu2 %v157_v48  ;;  %v295_v29 = vld [vmem:[#allocation2] ss:$0 sm:$0xff] }
  0x19   :  { %267 = vmatmul.msk.f32.gmra.mxu0 %vm47_vm0, %v36_v14  ;;  %131 = vmatpush.msra.mxu1 %v104_v18 }
  0x1a   :  { %286 = vmatpush.msra.mxu3 %v104_v18 }
  0x1b   :  { %132 = vmatpush.msra.mxu1 %v103_v20 }
  0x1c   :  { %287 = vmatpush.msra.mxu3 %v103_v20 }
  0x1d   :  { %133 = vmatpush.msra.mxu1 %v102_v22 }
  0x1e   :  { %288 = vmatpush.msra.mxu3 %v102_v22 }
  0x1f   :  { %134 = vmatpush.msra.mxu1 %v101_v23 }
  0x20   :  { %289 = vmatpush.msra.mxu3 %v101_v23 }
  0x21   :  { %268 = vmatmul.msk.f32.gmra.mxu0 %vm47_vm0, %v37_v19  ;;  %135 = vmatpush.msra.mxu1 %v100_v24 }
  0x22   :  { %290 = vmatpush.msra.mxu3 %v100_v24 }
  0x29   :  { %269 = vmatmul.msk.f32.gmra.mxu0 %vm47_vm0, %v38_v21 }
  0x86   :  { %v80_v26 = vpop.f32.mrf.mxu0 }
  0x87   :  { %v81_v27 = vadd.f32 %v291_v25, %v80_v26 }
  0x89   :  { %v95_v28 = vmax.f32 %v81_v27, 0.0 }
  0x8b   :  { %136 = vmatmul.f32.vlgmr.msra.gmra.mxu1 %v95_v28 }
  0x8e   :  { %v83_v32 = vpop.f32.mrf.mxu0 }
  0x8f   :  { %v84_v33 = vadd.f32 %v291_v25, %v83_v32 }
  0x91   :  { %v96_v35 = vmax.f32 %v84_v33, 0.0 }
  0x93   :  { %139 = vmatmul.f32.gmra.mxu1 %v96_v35 }
  0x96   :  { %v86_v37 = vpop.f32.mrf.mxu0 }
  0x97   :  { %v87_v38 = vadd.f32 %v291_v25, %v86_v37 }
  0x99   :  { %v97_v39 = vmax.f32 %v87_v38, 0.0 }
  0x9b   :  { %142 = vmatmul.f32.gmra.mxu1 %v97_v39 }
  0x9e   :  { %v89_v40 = vpop.f32.mrf.mxu0 }
  0x9f   :  { %v90_v41 = vadd.f32 %v291_v25, %v89_v40 }
  0xa1   :  { %v98_v42 = vmax.f32 %v90_v41, 0.0 }
  0xa3   :  { %145 = vmatmul.f32.vlgmr.msra.gmra.mxu3 %v98_v42 }
  0xa6   :  { %v92_v43 = vpop.f32.mrf.mxu0 }
  0xa7   :  { %v93_v44 = vadd.f32 %v291_v25, %v92_v43 }
  0xa9   :  { %v99_v45 = vmax.f32 %v93_v44, 0.0 }
  0xab   :  { %148 = vmatmul.f32.gmra.mxu3 %v99_v45 }
 0x108   :  { %v137_v50 = vpop.f32.mrf.mxu1 }
 0x109   :  { %v138_v51 = vadd.f32 %v292_v49, %v137_v50 }
 0x10b   :  { %v152_v52 = vmax.f32 %v138_v51, 0.0 }
 0x10d   :  { %270 = vmatmul.msk.f32.vlgmr.msra.gmra.mxu2 %vm169_vm1, %v152_v52 }
 0x110   :  { %v140_v53 = vpop.f32.mrf.mxu1 }
 0x111   :  { %v141_v54 = vadd.f32 %v292_v49, %v140_v53 }
 0x113   :  { %v153_v55 = vmax.f32 %v141_v54, 0.0 }
 0x115   :  { %271 = vmatmul.msk.f32.gmra.mxu2 %vm169_vm1, %v153_v55 }
 0x118   :  { %v143_v56 = vpop.f32.mrf.mxu1 }
 0x119   :  { %v144_v57 = vadd.f32 %v292_v49, %v143_v56 }
 0x11b   :  { %v154_v58 = vmax.f32 %v144_v57, 0.0 }
 0x11d   :  { %272 = vmatmul.msk.f32.gmra.mxu2 %vm169_vm1, %v154_v58 }
 0x126   :  { %v146_v59 = vpop.f32.mrf.mxu3 }
 0x127   :  { %v147_v60 = vadd.f32 %v292_v49, %v146_v59 }
 0x129   :  { %v155_v61 = vmax.f32 %v147_v60, 0.0 }
 0x12b   :  { %273 = vmatmul.msk.f32.gmra.mxu2 %vm169_vm1, %v155_v61 }
 0x12e   :  { %v149_v62 = vpop.f32.mrf.mxu3 }
 0x12f   :  { %v150_v63 = vadd.f32 %v292_v49, %v149_v62 }
 0x131   :  { %v156_v0 = vmax.f32 %v150_v63, 0.0 }
 0x133   :  { %274 = vmatmul.msk.f32.gmra.mxu2 %vm169_vm1, %v156_v0 }
 0x190   :  { %v202_v2 = vpop.f32.mrf.mxu2 }
 0x191   :  { %v203_v3 = vadd.f32 %v293_v1, %v202_v2 }
 0x193   :  { %v217_v5 = vmax.f32 %v203_v3, 0.0 }
 0x195   :  { %v226_v6 = vmul.f32 %v294_v4, %v217_v5 }
 0x197   :  { %v231_v7 = vsel %vm47_vm0, %v226_v6, 0.0 }
 0x198   :  { %v205_v8 = vpop.f32.mrf.mxu2  ;;  %232 = vadd.xlane.f32.xlu0 %v231_v7 }
 0x199   :  { %v206_v9 = vadd.f32 %v293_v1, %v205_v8 }
 0x19b   :  { %v218_v10 = vmax.f32 %v206_v9, 0.0 }
 0x19d   :  { %v227_v11 = vmul.f32 %v294_v4, %v218_v10 }
 0x19f   :  { %v234_v13 = vsel %vm47_vm0, %v227_v11, 0.0 }
 0x1a0   :  { %v208_v14 = vpop.f32.mrf.mxu2  ;;  %235 = vadd.xlane.f32.xlu0 %v234_v13 }
 0x1a1   :  { %v209_v15 = vadd.f32 %v293_v1, %v208_v14 }
 0x1a3   :  { %v219_v16 = vmax.f32 %v209_v15, 0.0 }
 0x1a5   :  { %v228_v17 = vmul.f32 %v294_v4, %v219_v16 }
 0x1a7   :  { %v237_v18 = vsel %vm47_vm0, %v228_v17, 0.0 }
 0x1a8   :  { %238 = vadd.xlane.f32.xlu1 %v237_v18 }
 0x1ae   :  { %v211_v19 = vpop.f32.mrf.mxu2 }
 0x1af   :  { %v212_v20 = vadd.f32 %v293_v1, %v211_v19 }
 0x1b1   :  { %v220_v21 = vmax.f32 %v212_v20, 0.0 }
 0x1b3   :  { %v229_v22 = vmul.f32 %v294_v4, %v220_v21 }
 0x1b5   :  { %v240_v23 = vsel %vm47_vm0, %v229_v22, 0.0 }
 0x1b6   :  { %v214_v24 = vpop.f32.mrf.mxu2  ;;  %241 = vadd.xlane.f32.xlu1 %v240_v23 }
 0x1b7   :  { %v215_v25 = vadd.f32 %v293_v1, %v214_v24 }
 0x1b9   :  { %v221_v26 = vmax.f32 %v215_v25, 0.0 }
 0x1bb   :  { %v230_v27 = vmul.f32 %v294_v4, %v221_v26 }
 0x1bd   :  { %v243_v28 = vsel %vm47_vm0, %v230_v27, 0.0 }
 0x1be   :  { %244 = vadd.xlane.f32.xlu2 %v243_v28 }
 0x20b   :  { %v233_v30 = vpop.xlane.xlu0 %232 }
 0x20c   :  { %v250_v31 = vadd.f32 %v295_v29, %v233_v30 }
 0x20e   :  { %256 = vst.msk [vmem:[%s499_s9] sm:$0xff] %vm255_vm2, %v250_v31 }
 0x213   :  { %v236_v32 = vpop.xlane.xlu0 %235 }
 0x214   :  { %v251_v33 = vadd.f32 %v295_v29, %v236_v32 }
 0x216   :  { %257 = vst.msk [vmem:[%s499_s9 + $0x8] sm:$0xff] %vm255_vm2, %v251_v33 }
 0x21b   :  { %v239_v34 = vpop.xlane.xlu1 %238 }
 0x21c   :  { %v252_v35 = vadd.f32 %v295_v29, %v239_v34 }
 0x21e   :  { %258 = vst.msk [vmem:[%s499_s9 + $0x10] sm:$0xff] %vm255_vm2, %v252_v35 }
 0x229   :  { %v242_v36 = vpop.xlane.xlu1 %241 }
 0x22a   :  { %v253_v37 = vadd.f32 %v295_v29, %v242_v36 }
 0x22c   :  { %259 = vst.msk [vmem:[%s499_s9 + $0x18] sm:$0xff] %vm255_vm2, %v253_v37 }
 0x231   :  { %v245_v38 = vpop.xlane.xlu2 %244 }
 0x232   :  { %v254_v39 = vadd.f32 %v295_v29, %v245_v38 }
 0x234   :  { %260 = vst.msk [vmem:[%s499_s9 + $0x20] sm:$0xff] %vm255_vm2, %v254_v39 }

</bundles_post_ra>
